<compile_context>
chip_gen: v5e
topology: v5e:2x2
jax: 0.10.0
libtpu: 0.0.40
codegen_flags: <defaults>
</compile_context>

<pallas_src>
import jax
import jax.numpy as jnp
from jax.experimental import pallas as pl
from jax.experimental.pallas import tpu as pltpu


def _round_up(x, m):
    return (x + m - 1) // m * m


def _final_model_kernel(x_ref, we_ref, be_ref, wf_ref, bf_ref, out_ref, acc_ref):
    """One (batch-tile i, hidden-tile k) grid step.

    h_k  = sigmoid(x_i @ W_enc[:, k*th:(k+1)*th] + b_enc[:, k*th:(k+1)*th])   (f32)
    acc += h_k @ W_fc[k*th:(k+1)*th, :]                                       (f32 acc)
    on last k:  out_i = acc + b_fc
    """
    k = pl.program_id(1)

    @pl.when(k == 0)
    def _():
        acc_ref[...] = jnp.zeros_like(acc_ref)

    # Encoder matmul: bf16 operands on the MXU, f32 accumulation.
    h = jnp.dot(x_ref[...], we_ref[...], preferred_element_type=jnp.float32)
    # Bias + sigmoid in f32 (VPU/EUP); bias block is resident across the batch axis.
    h = jax.nn.sigmoid(h + be_ref[...])
    # FC matmul: contract this hidden chunk into the resident f32 accumulator.
    acc_ref[...] += jnp.dot(h.astype(jnp.bfloat16), wf_ref[...],
                            preferred_element_type=jnp.float32)

    @pl.when(k == pl.num_programs(1) - 1)
    def _():
        out_ref[...] = (acc_ref[...] + bf_ref[...]).astype(out_ref.dtype)


def final_model_forward(data, w_enc, b_enc, w_fc, b_fc, *, tile_b=None, tile_h=None):
    """data: [B, F]; w_enc: [F, H]; b_enc: [1, H]; w_fc: [H, O]; b_fc: [1, O].
    (Weights are already laid out [in, out], i.e. PyTorch W^T.)"""
    B, F = data.shape
    H = w_enc.shape[1]
    O = w_fc.shape[1]

    f32, bf16 = jnp.float32, jnp.bfloat16

    # --- Tile selection (sublane/lane aligned) + padding ---------------------
    if tile_b is None:
        tile_b = min(256, _round_up(B, 8))          # batch tile, multiple of 8
    if tile_h is None:
        tile_h = min(1024, _round_up(H, 128))       # hidden tile, multiple of 128
    B_pad = _round_up(B, tile_b)
    H_pad = _round_up(H, tile_h)
    O_pad = _round_up(O, 128)                       # lane-dense output slab

    # Pad + cast matmul operands to bf16 (halves weight DMA, MXU peak dtype).
    x_p  = jnp.zeros((B_pad, F), bf16).at[:B, :].set(data.astype(bf16))
    we_p = jnp.zeros((F, H_pad), bf16).at[:, :H].set(w_enc.astype(bf16))
    be_p = jnp.zeros((1, H_pad), f32).at[:, :H].set(b_enc.astype(f32))
    # Padded hidden rows of W_fc are zero, so padded hidden units (sigmoid(0)=0.5)
    # contribute nothing to the output; padded output columns are sliced off below.
    wf_p = jnp.zeros((H_pad, O_pad), bf16).at[:H, :O].set(w_fc.astype(bf16))
    bf_p = jnp.zeros((1, O_pad), f32).at[:, :O].set(b_fc.astype(f32))

    grid = (B_pad // tile_b, H_pad // tile_h)

    cost = pl.CostEstimate(
        flops=2 * B_pad * (F * H_pad + H_pad * O_pad),
        transcendentals=B_pad * H_pad,                       # sigmoid
        bytes_accessed=(x_p.size * 2 + we_p.size * 2 + wf_p.size * 2
                        + be_p.size * 4 + bf_p.size * 4 + B_pad * O_pad * 4),
    )

    out_padded = pl.pallas_call(
        _final_model_kernel,
        out_shape=jax.ShapeDtypeStruct((B_pad, O_pad), f32),
        grid_spec=pltpu.PrefetchScalarGridSpec(
            num_scalar_prefetch=0,
            grid=grid,
            in_specs=[
                pl.BlockSpec((tile_b, F),     lambda i, k: (i, 0)),   # x (batch tile)
                pl.BlockSpec((F, tile_h),     lambda i, k: (0, k)),   # W_enc (hidden tile)
                pl.BlockSpec((1, tile_h),     lambda i, k: (0, k)),   # b_enc (hidden tile)
                pl.BlockSpec((tile_h, O_pad), lambda i, k: (k, 0)),   # W_fc (hidden tile)
                pl.BlockSpec((1, O_pad),      lambda i, k: (0, 0)),   # b_fc (resident)
            ],
            out_specs=pl.BlockSpec((tile_b, O_pad), lambda i, k: (i, 0)),
            scratch_shapes=[pltpu.VMEM((tile_b, O_pad), f32)],        # f32 accumulator
        ),
        compiler_params=pltpu.CompilerParams(
            dimension_semantics=("parallel", "arbitrary"),   # batch || , hidden = reduction
            vmem_limit_bytes=48 * 1024 * 1024,               # fits v7x 64 MiB budget
        ),
        cost_estimate=cost,
    )(x_p, we_p, be_p, wf_p, bf_p)

    return out_padded[:B, :O]


def _reference_f32(data, w_enc, b_enc, w_fc, b_fc):
    h = jax.nn.sigmoid(data @ w_enc + b_enc)
    return h @ w_fc + b_fc


def _reference_bf16(data, w_enc, b_enc, w_fc, b_fc):
    # Mirrors the kernel's numerics: bf16 matmul operands, f32 accumulation,
    # f32 bias + sigmoid.
    bf16 = jnp.bfloat16
    h = jax.nn.sigmoid(
        jnp.dot(data.astype(bf16), w_enc.astype(bf16),
                preferred_element_type=jnp.float32) + b_enc)
    return jnp.dot(h.astype(bf16), w_fc.astype(bf16),
                   preferred_element_type=jnp.float32) + b_fc


if __name__ == "__main__":
    # Small shapes implied by final_model(feature_sz, hidden_sz, output_sz, l1weight).
    # hidden_sz=256 with tile_h=128 and batch=16 with tile_b=8 exercise a real
    # (2, 2) grid: batch pipelining + hidden-dim K-reduction with the accumulator.
    batch, feature_sz, hidden_sz, output_sz = 16, 32, 256, 4

    key = jax.random.PRNGKey(0)
    k0, k1, k2, k3, k4 = jax.random.split(key, 5)

    data  = jax.random.normal(k0, (batch, feature_sz), dtype=jnp.float32)
    # Deterministic synthetic parameters (roughly nn.Linear init scale).
    w_enc = jax.random.uniform(k1, (feature_sz, hidden_sz), jnp.float32,
                               minval=-1.0, maxval=1.0) / jnp.sqrt(feature_sz)
    b_enc = jax.random.uniform(k2, (1, hidden_sz), jnp.float32,
                               minval=-1.0, maxval=1.0) / jnp.sqrt(feature_sz)
    w_fc  = jax.random.uniform(k3, (hidden_sz, output_sz), jnp.float32,
                               minval=-1.0, maxval=1.0) / jnp.sqrt(hidden_sz)
    b_fc  = jax.random.uniform(k4, (1, output_sz), jnp.float32,
                               minval=-1.0, maxval=1.0) / jnp.sqrt(hidden_sz)

    out = final_model_forward(data, w_enc, b_enc, w_fc, b_fc, tile_b=8, tile_h=128)
    out = jax.block_until_ready(out)

    ref_bf = _reference_bf16(data, w_enc, b_enc, w_fc, b_fc)
    ref_32 = _reference_f32(data, w_enc, b_enc, w_fc, b_fc)

    assert out.shape == (batch, output_sz)
    assert jnp.allclose(out, ref_bf, atol=2e-3, rtol=2e-3), "mismatch vs bf16-matched reference"
    assert jnp.allclose(out, ref_32, atol=5e-2, rtol=5e-2), "mismatch vs f32 reference"

    print("KERNEL_OK")
</pallas_src>

<mosaic_0001>
module attributes {stable_mosaic.version = 11 : i64} {
  func.func @_final_model_kernel(%arg0: i32, %arg1: i32, %arg2: memref<8x32xbf16, #tpu.memory_space<vmem>>, %arg3: memref<32x128xbf16, #tpu.memory_space<vmem>>, %arg4: memref<1x128xf32, #tpu.memory_space<vmem>>, %arg5: memref<128x128xbf16, #tpu.memory_space<vmem>>, %arg6: memref<1x128xf32, #tpu.memory_space<vmem>>, %arg7: memref<8x128xf32, #tpu.memory_space<vmem>>, %arg8: memref<8x128xf32, #tpu.memory_space<vmem>>) attributes {dimension_semantics = [#tpu.dimension_semantics<parallel>, #tpu.dimension_semantics<arbitrary>], iteration_bounds = array<i64: 2, 2>, scalar_prefetch = 0 : i64, scratch_operands = 1 : i64, tpu.core_type = #tpu.core_type<tc>, window_params = [{transform_indices = @transform_0, window_bounds = array<i64: 8, 32>}, {transform_indices = @transform_1, window_bounds = array<i64: 32, 128>}, {transform_indices = @transform_2, window_bounds = array<i64: 1, 128>}, {transform_indices = @transform_3, window_bounds = array<i64: 128, 128>}, {pipeline_mode = #tpu.pipeline_mode<synchronous>, transform_indices = @transform_4, window_bounds = array<i64: 1, 128>}, {transform_indices = @transform_5, window_bounds = array<i64: 8, 128>}]} {
    %c0_i32 = arith.constant 0 : i32
    %0 = arith.cmpi eq, %arg1, %c0_i32 : i32
    %1 = arith.extui %0 : i1 to i32
    %c0_i32_0 = arith.constant 0 : i32
    %2 = arith.cmpi ne, %1, %c0_i32_0 : i32
    scf.if %2 {
      %cst_15 = arith.constant 0.000000e+00 : f32
      %23 = vector.broadcast %cst_15 : f32 to vector<8x128xf32>
      %c0_16 = arith.constant 0 : index
      %c0_17 = arith.constant 0 : index
      %24 = vector.load %arg8[%c0_16, %c0_17] : memref<8x128xf32, #tpu.memory_space<vmem>>, vector<8x128xf32>
      tpu.vector_store %arg8[%c0_16, %c0_17], %23 {strides = array<i32>} : memref<8x128xf32, #tpu.memory_space<vmem>>, vector<8x128xf32>,
    } else {
    }
    %c0 = arith.constant 0 : index
    %c0_1 = arith.constant 0 : index
    %3 = vector.load %arg2[%c0, %c0_1] : memref<8x32xbf16, #tpu.memory_space<vmem>>, vector<8x32xbf16>
    %c0_2 = arith.constant 0 : index
    %c0_3 = arith.constant 0 : index
    %4 = vector.load %arg3[%c0_2, %c0_3] : memref<32x128xbf16, #tpu.memory_space<vmem>>, vector<32x128xbf16>
    %cst = arith.constant dense<0.000000e+00> : vector<8x128xf32>
    %5 = tpu.matmul %3, %4, %cst {dimension_numbers = #tpu.dot_dimension_numbers<[1], [0], [0], [1], [0, 0, 1, 1], [], []>} : vector<8x32xbf16>, vector<32x128xbf16>, vector<8x128xf32> -> vector<8x128xf32>
    %c0_4 = arith.constant 0 : index
    %c0_5 = arith.constant 0 : index
    %6 = vector.load %arg4[%c0_4, %c0_5] : memref<1x128xf32, #tpu.memory_space<vmem>>, vector<1x128xf32>
    %7 = vector.broadcast %6 : vector<1x128xf32> to vector<8x128xf32>
    %8 = arith.addf %5, %7 : vector<8x128xf32>
    %9 = arith.negf %8 : vector<8x128xf32>
    %10 = math.exp %9 : vector<8x128xf32>
    %cst_6 = arith.constant 1.000000e+00 : f32
    %11 = vector.broadcast %cst_6 : f32 to vector<8x128xf32>
    %12 = arith.addf %11, %10 : vector<8x128xf32>
    %13 = arith.divf %11, %12 : vector<8x128xf32>
    %c0_7 = arith.constant 0 : index
    %c0_8 = arith.constant 0 : index
    %14 = vector.load %arg8[%c0_7, %c0_8] : memref<8x128xf32, #tpu.memory_space<vmem>>, vector<8x128xf32>
    %15 = arith.truncf %13 : vector<8x128xf32> to vector<8x128xbf16>
    %c0_9 = arith.constant 0 : index
    %c0_10 = arith.constant 0 : index
    %16 = vector.load %arg5[%c0_9, %c0_10] : memref<128x128xbf16, #tpu.memory_space<vmem>>, vector<128x128xbf16>
    %cst_11 = arith.constant dense<0.000000e+00> : vector<8x128xf32>
    %17 = tpu.matmul %15, %16, %cst_11 {dimension_numbers = #tpu.dot_dimension_numbers<[1], [0], [0], [1], [0, 0, 1, 1], [], []>} : vector<8x128xbf16>, vector<128x128xbf16>, vector<8x128xf32> -> vector<8x128xf32>
    %18 = arith.addf %14, %17 : vector<8x128xf32>
    %c0_12 = arith.constant 0 : index
    %c0_13 = arith.constant 0 : index
    %19 = vector.load %arg8[%c0_12, %c0_13] : memref<8x128xf32, #tpu.memory_space<vmem>>, vector<8x128xf32>
    tpu.vector_store %arg8[%c0_12, %c0_13], %18 {strides = array<i32>} : memref<8x128xf32, #tpu.memory_space<vmem>>, vector<8x128xf32>,
    %c1_i32 = arith.constant 1 : i32
    %20 = arith.cmpi eq, %arg1, %c1_i32 : i32
    %21 = arith.extui %20 : i1 to i32
    %c0_i32_14 = arith.constant 0 : i32
    %22 = arith.cmpi ne, %21, %c0_i32_14 : i32
    scf.if %22 {
      %c0_15 = arith.constant 0 : index
      %c0_16 = arith.constant 0 : index
      %23 = vector.load %arg8[%c0_15, %c0_16] : memref<8x128xf32, #tpu.memory_space<vmem>>, vector<8x128xf32>
      %c0_17 = arith.constant 0 : index
      %c0_18 = arith.constant 0 : index
      %24 = vector.load %arg6[%c0_17, %c0_18] : memref<1x128xf32, #tpu.memory_space<vmem>>, vector<1x128xf32>
      %25 = vector.broadcast %24 : vector<1x128xf32> to vector<8x128xf32>
      %26 = arith.addf %23, %25 : vector<8x128xf32>
      %c0_19 = arith.constant 0 : index
      %c0_20 = arith.constant 0 : index
      %27 = vector.load %arg7[%c0_19, %c0_20] : memref<8x128xf32, #tpu.memory_space<vmem>>, vector<8x128xf32>
      tpu.vector_store %arg7[%c0_19, %c0_20], %26 {strides = array<i32>} : memref<8x128xf32, #tpu.memory_space<vmem>>, vector<8x128xf32>,
    } else {
    }
    return
  }
  func.func @transform_0(%arg0: i32, %arg1: i32) -> (i32, i32) {
    %c0_i32 = arith.constant 0 : i32
    %c0_i32_0 = arith.constant 0 : i32
    return %arg0, %c0_i32 : i32, i32
  }
  func.func @transform_1(%arg0: i32, %arg1: i32) -> (i32, i32) {
    %c0_i32 = arith.constant 0 : i32
    %c0_i32_0 = arith.constant 0 : i32
    return %c0_i32, %arg1 : i32, i32
  }
  func.func @transform_2(%arg0: i32, %arg1: i32) -> (i32, i32) {
    %c0_i32 = arith.constant 0 : i32
    %c0_i32_0 = arith.constant 0 : i32
    return %c0_i32, %arg1 : i32, i32
  }
  func.func @transform_3(%arg0: i32, %arg1: i32) -> (i32, i32) {
    %c0_i32 = arith.constant 0 : i32
    %c0_i32_0 = arith.constant 0 : i32
    return %arg1, %c0_i32 : i32, i32
  }
  func.func @transform_4(%arg0: i32, %arg1: i32) -> (i32, i32) {
    %c0_i32 = arith.constant 0 : i32
    %c0_i32_0 = arith.constant 0 : i32
    %c0_i32_1 = arith.constant 0 : i32
    return %c0_i32, %c0_i32_0 : i32, i32
  }
  func.func @transform_5(%arg0: i32, %arg1: i32) -> (i32, i32) {
    %c0_i32 = arith.constant 0 : i32
    %c0_i32_0 = arith.constant 0 : i32
    return %arg0, %c0_i32 : i32, i32
  }
}

</mosaic_0001>

<bundles_post_ra>
// kernel: tpu_custom_call.1
= control target key start
LH: loop header
LB: loop body
LE: loop exit
PB: predicated region body
PF: predicated region fallthrough
CT: control target
= control target key end

     0   :  { %s1457_s0 = inlined_call_operand.hbm [shape: bf16[16,32], index: 0, kind: input, shape index: {}]   ;;  %s1458_s1 = inlined_call_operand.hbm [shape: bf16[32,256], index: 1, kind: input, shape index: {}]   ;;  %s1459_s2 = inlined_call_operand.hbm [shape: f32[1,256], index: 2, kind: input, shape index: {}]   ;;  %s1460_s3 = inlined_call_operand.hbm [shape: bf16[256,128], index: 3, kind: input, shape index: {}]   ;;  %s1461_s4 = inlined_call_operand.vmem [shape: f32[1,128], index: 4, kind: input, shape index: {}]   ;;  %s1462_s5 = inlined_call_operand.hbm [shape: f32[16,128], index: 5, kind: output, shape index: {}]  }
   0x1   :  { %1474 = sst [smem:[#allocation26_spill]] %s1457_s0 }
   0x2   :  { %1475 = sst [smem:[#allocation27_spill]] %s1458_s1 }
   0x3   :  { %1476 = sst [smem:[#allocation28_spill]] %s1461_s4 }
   0x4   :  { %1477 = sst [smem:[#allocation29_spill]] %s1462_s5 }
   0x5   :  { %10 = vsyncpa [#allocation4], 0 }
   0x6   :  { %12 = vsyncpa [#allocation4 + $0x1], 0 }
   0x7   :  { %13 = vsyncpa [#allocation7], 0 }
   0x8   :  { %15 = vsyncpa [#allocation7 + $0x1], 0 }
   0x9   :  { %16 = vsyncpa [#allocation10], 0 }
   0xa   :  { %18 = vsyncpa [#allocation10 + $0x1], 0 }
   0xb   :  { %19 = vsyncpa [#allocation5], 0 }
   0xc   :  { %21 = vsyncpa [#allocation5 + $0x1], 0  ;;  %s1172_s18 = smov 0   ;;  %s1174_s19 = smov 0  }
   0xd   :  { %s1176_s20 = smov 0   ;;  %s1178_s21 = smov 0  }
   0xe   :  { %s1180_s22 = smov 0   ;;  %s1182_s23 = smov 0  }
   0xf   :  { %s1184_s24 = smov 0   ;;  %s1186_s25 = smov 0  }
  0x10   :  { %s1188_s26 = smov 0   ;;  %s1190_s27 = smov 0  }
  0x11   :  { %s1192_s28 = smov 0  }
  0x12 LB: > { %1478 = sst [smem:[#allocation16_spill]] %s1104_s20  ;;  %p54_p0 = scmp.eq.s32.totalorder %s1136_s28, 0  ;;  %s1136_s28 = sphi %s1192_s28, %s27_s28   ;;  %s1132_s27 = sphi %s1190_s27, %s1512_s27   ;;  %s1128_s26 = sphi %s1188_s26, %s1518_s26   ;;  %s1124_s25 = sphi %s1186_s25, %s1510_s25   ;;  %s1120_s24 = sphi %s1184_s24, %s1517_s24   ;;  %s1116_s23 = sphi %s1182_s23, %s1509_s23   ;;  %s1112_s22 = sphi %s1180_s22, %s1516_s22   ;;  %s1108_s21 = sphi %s1178_s21, %s1515_s21   ;;  %s1104_s20 = sphi %s1176_s20, %s1507_s20   ;;  %s1100_s19 = sphi %s1174_s19, %s1514_s19   ;;  %s1096_s18 = sphi %s1172_s18, %s1513_s18  }
  0x13   : > { %1479 = sst [smem:[#allocation17_spill]] %s1108_s21  ;;  %p79_p1 = scmp.ne.s32.totalorder %s1104_s20, %s1100_s19 }
  0x14   : > { %1480 = sst [smem:[#allocation18_spill]] %s1116_s23  ;;  %p1467_p2 = scmp.lt.s32.totalorder %s1136_s28, 4 }
  0x15   : > { %1481 = sst [smem:[#allocation19_spill]] %s1124_s25  ;;  %s230_s30 = sand.u32 1, %s1136_s28  }
  0x16   : > { %1482 = sst [smem:[#allocation20_spill]] %s1132_s27  ;;  %p81_p3 = por %p79_p1, %p54_p0 }
  0x17   : > { %s1236_s6 = sand.u32 1, %s1104_s20   ;;  %s691_s7 = sshll.u32 %s1128_s26, 2 }
  0x18   : > { %s690_s8 = sshll.u32 %s1236_s6, 4  ;;  %s1483_s1 = sld [smem:[#allocation27_spill]] }
  0x19   : > { %s234_s13 = scalar_lea.vmem [#allocation6], %s690_s8  ;;  %p1245_p4 = pnand %p1467_p2, %p81_p3 }
  0x1a   : > { %s241_s14 = sshll.u32 %s234_s13, 4  ;;  %s1249_s16 = scalar_lea.sflag [#allocation7], %s230_s30  ;;  %s242_s14 = int_to_ptr.vmem [resolvable:$true] %s241_s14 }
  0x1b   : > { %s1138_s17 = smov 128   ;;  %s1464_s8 = smov 4  }
  0x1c   : > { %p695_p5 = scmp.ge.s32.totalorder %s1136_s28, 1  ;;  %p288_p6 = scmp.lt.s32.totalorder %s1136_s28, 5 }
  0x1d   : > { %s1263_s9 = sadd.s32 4294967295, %s1136_s28   ;;  %s685_s10 = sadd.s32 4294967294, %s1136_s28  }
  0x1e   : > { %s238_s11 = scalar_lea.hbm %s1483_s1, %s691_s7  ;;  %s1463_s7 = smov 64  }
  0x1f   : > { %s239_s12 = sshll.u32 %s238_s11, 4  ;;  %p1258_p7 = pnand %p695_p5, %p288_p6  ;;  %s240_s12 = int_to_ptr.hbm [resolvable:$true] %s239_s12 }
  0x20   : > { %775 = dma.hbm_to_vmem [thread:$0]  (!%p1245_p4), %s240_s12, 256, %s242_s14, %s1249_s16, %s1138_s17, %s1463_s7, %s1464_s8  }
  0x21   : > { %s36_s11 = sadd.s32 1, %s1128_s26  ;;  %s39_s13 = sadd.s32 1, %s1132_s27 }
  0x22   : > { %p37_p8 = scmp.ge.s32.totalorder %s36_s11, 2  ;;  %s46_s12 = sadd.s32 1, %s1116_s23 }
  0x23   : > { %p53_p9 = scmp.ne.s32.totalorder %s1116_s23, %s1112_s22  ;;  %p59_p11 = scmp.ne.s32.totalorder %s1112_s22, %s1108_s21 }
  0x24   : > { %s1520_s11 = smov (%p37_p8, %s36_s11), 0  ;;  %s1522_s13 = smov (!%p37_p8, %s39_s13), %s1132_s27 }
  0x25   : > { %1486 = sst [smem:[#allocation21_spill]] %s1520_s11  ;;  %p1279_p10 = por %p54_p0, %p53_p9 }
  0x26   : > { %p41_p12 = scmp.ge.s32.totalorder %s1522_s13, 2  ;;  %p60_p13 = scmp.eq.s32.totalorder %s1263_s9, 0 }
  0x27   : > { %s69_s17 = ssub.s32 %s1128_s26, %s1520_s11  ;;  %p85_p1 = scmp.ne.s32.totalorder %s1100_s19, %s1096_s18 }
  0x28   : > { %s1524_s13 = smov (%p41_p12, %s1522_s13), 0  ;;  %p1295_p3 = por %p60_p13, %p59_p11 }
  0x29   : > { %1488 = sst [smem:[#allocation22_spill]] %s1524_s13  ;;  %p70_p0 = scmp.eq.s32.totalorder %s69_s17, 0 }
  0x2a   : > { %s43_s8 = ssub.s32 %s1132_s27, %s1524_s13  ;;  %p1301_p5 = por %p85_p1, %p60_p13 }
  0x2b   : > { %p44_p6 = scmp.eq.s32.totalorder %s43_s8, 0  ;;  %p182_p8 = scmp.eq.s32.totalorder %s1263_s9, 3 }
  0x2c   : > { %s1491_s1 = sadd.s32 1, %s1104_s20  ;;  %p188_p2 = scmp.eq.s32.totalorder %s685_s10, 3 }
  0x2d   : > { %s1309_s18 = scalar_select %p70_p0, %s1104_s20, %s1491_s1  }
  0x2e   : > { %s1312_s11 = scalar_select %p44_p6, %s1116_s23, %s46_s12  }
  0x2f   : > { %1492 = sst [smem:[#allocation23_spill]] %s1309_s18  ;;  %p1317_p12 = por %p182_p8, %p53_p9 }
  0x30   : > { %1493 = sst [smem:[#allocation24_spill]] %s1312_s11  ;;  %s211_s17 = sand.u32 1, %s1116_s23  }
  0x31   : > { %s689_s13 = sshll.u32 %s1132_s27, 2  ;;  %p1326_p13 = por %p188_p2, %p59_p11 }
  0x32   : > { %s688_s25 = sshll.u32 %s211_s17, 2  ;;  %s1497_s0 = sld [smem:[#allocation26_spill]] }
  0x33   : > { %s1495_s8 = scalar_select %p1326_p13, 1, 0 }
  0x34   : > { %s215_s10 = scalar_lea.vmem [#allocation3], %s688_s25  ;;  %p1498_p9 = scmp.lt.s32.totalorder %s1136_s28, 4 }
  0x35   : > { %1496 = sst [smem:[#allocation25_spill]] %s1495_s8  ;;  %s223_s23 = sshll.u32 %s215_s10, 4  ;;  %s224_s23 = int_to_ptr.vmem [resolvable:$true] %s223_s23 }
  0x36   : > { %p770_p2 = pnand %p1498_p9, %p1279_p10  ;;  %s257_s20 = scalar_lea.hbm %s1459_s2, %s1128_s26 }
  0x37   : > { %s259_s8 = sshll.u32 %s257_s20, 4  ;;  %s212_s4 = scalar_lea.sflag [#allocation4], %s211_s17  ;;  %s260_s8 = int_to_ptr.hbm [resolvable:$true] %s259_s8 }
  0x38   : > { %s219_s12 = scalar_lea.hbm %s1497_s0, %s689_s13  ;;  %s254_s13 = scalar_lea.vmem [#allocation8], %s1236_s6 }
  0x39   : > { %s221_s11 = sshll.u32 %s219_s12, 4  ;;  %s261_s1 = sshll.u32 %s254_s13, 4  ;;  %s222_s11 = int_to_ptr.hbm [resolvable:$true] %s221_s11  ;;  %s262_s1 = int_to_ptr.vmem [resolvable:$true] %s261_s1 }
  0x3a   : > { %772 = dma.hbm_to_vmem [thread:$0]  (!%p770_p2), %s222_s11, 64, %s224_s23, %s212_s4  }
  0x3b   : > { %778 = dma.hbm_to_vmem [thread:$0]  (!%p1245_p4), %s260_s8, 16, %s262_s1, %s1249_s16  }
  0x3c   : > { %s692_s25 = sshll.u32 %s1236_s6, 6  ;;  %s748_s12 = sshll.u32 %s1128_s26, 6 }
  0x3d   : > { %s277_s0 = scalar_lea.hbm %s1460_s3, %s748_s12  ;;  %s272_s27 = scalar_lea.vmem [#allocation9], %s692_s25 }
  0x3e   : > { %s278_s21 = sshll.u32 %s277_s0, 4  ;;  %s280_s18 = sshll.u32 %s272_s27, 4  ;;  %s279_s21 = int_to_ptr.hbm [resolvable:$true] %s278_s21  ;;  %s281_s18 = int_to_ptr.vmem [resolvable:$true] %s280_s18 }
  0x3f   : > { %s269_s20 = scalar_lea.sflag [#allocation10], %s1236_s6  ;;  %s1499_s23 = smov 4  }
  0x40   : > { %s1500_s11 = smov 64   ;;  %292 = sbr.rel (%p1258_p7) target bundleno = 412 (0x19c), region = 40 }
  0x41   : > { %781 = dma.hbm_to_vmem [thread:$0]  (!%p1245_p4), %s279_s21, 1024, %s281_s18, %s269_s20, %s1500_s11, %s1500_s11, %s1499_s23  }
  0x42   : > { %s1359_s16 = sand.u32 (!%p1258_p7), 1, %s1112_s22  }
  0x43   : > { %s696_s0 = sshll.u32 (!%p1258_p7), %s1359_s16, 2  ;;  %s295_s17 = scalar_lea.sflag (!%p1258_p7), [#allocation4], %s1359_s16 }
  0x44   : > { %s298_s8 = scalar_lea.vmem (!%p1258_p7), [#allocation3], %s696_s0 }
  0x45   : > { %1079 = dma.done.wait (%p1295_p3), %s295_s17, 64  }
  0x46   : > { %1081 = vsyncadd (%p1295_p3), %s295_s17, 4294967232  ;;  %s304_s21 = sand.u32 1, %s1263_s9   ;;  %s1369_s6 = sand.u32 1, %s1100_s19  }
  0x47   : > { %s697_s15 = sshll.u32 %s1369_s6, 4  ;;  %s305_s30 = scalar_lea.sflag [#allocation7], %s304_s21 }
  0x48   : > { %s308_s4 = scalar_lea.vmem [#allocation6], %s697_s15 }
  0x49   : > { %1083 = dma.done.wait (%p1301_p5), %s305_s30, 272  }
  0x4a   : > { %1085 = vsyncadd (%p1301_p5), %s305_s30, 4294967024  ;;  %s698_s7 = sshll.u32 %s1369_s6, 6  ;;  %s317_s13 = scalar_lea.vmem [#allocation8], %s1369_s6 }
  0x4b   : > { %s324_s1 = scalar_lea.sflag [#allocation10], %s1369_s6  ;;  %s1379_s25 = scalar_lea.vmem [#allocation9], %s698_s7 }
  0x4c   : > { %1087 = dma.done.wait (%p1301_p5), %s324_s1, 1024  }
  0x4d   : > { %1089 = vsyncadd (%p1301_p5), %s324_s1, 4294966272  ;;  %s699_s9 = sshll.u32 %s1359_s16, 3  ;;  %p700_p4 = scmp.ne.s32.totalorder %s1120_s24, 0 }
  0x4e   : > { %s1386_s12 = scalar_lea.vmem [#allocation11], %s699_s9 }
  0x4f   : > { %374 = sbr.rel (%p700_p4) target bundleno = 86 (0x56), region = 60 }
  0x54   : > { %v1141_v0 = vmov 0.0  }
  0x55   : > { %375 = vst [vmem:[#allocation2] sm:$0xff] %v1141_v0 }
  0x56 PF: > { %v750_v1 = vld [vmem:[%s308_s4 + $0x8] sm:$0xff]  ;;  %v749_v2 = vld [vmem:[%s308_s4] sm:$0xff]  ;;  %vm397_vm0 = vcmask 261120   ;;  %p743_p7 = scmp.ne.s32.totalorder %s1120_s24, 1 }
  0x57   : > { %407 = vmatpush.bf16.msra.mxu0 %v750_v1  ;;  %v376_v3 = vld [vmem:[%s298_s8] sm:$0xf]  ;;  %v756_v6 = vld [vmem:[%s1379_s25 + $0x28] sm:$0xff]  ;;  %v755_v7 = vld [vmem:[%s1379_s25 + $0x20] sm:$0xff]  ;;  %s1501_s10 = sld [smem:[#allocation28_spill]] (!%p743_p7) }
  0x58   : > { %v758_v4 = vld [vmem:[%s1379_s25 + $0x38] sm:$0xff]  ;;  %v757_v5 = vld [vmem:[%s1379_s25 + $0x30] sm:$0xff]  ;;  %v752_v10 = vld [vmem:[%s1379_s25 + $0x8] sm:$0xff] }
  0x59   : > { %499 = vmatpush.bf16.msra.mxu1 %v758_v4  ;;  %v754_v8 = vld [vmem:[%s1379_s25 + $0x18] sm:$0xff]  ;;  %v753_v9 = vld [vmem:[%s1379_s25 + $0x10] sm:$0xff]  ;;  %v751_v11 = vld [vmem:[%s1379_s25] sm:$0xff] }
  0x5a   : > { %v880_v12 = vld [vmem:[%s317_s13] ss:$0 sm:$0xff] }
  0x5b   : > { %408 = vmatpush.bf16.msra.mxu0 %v749_v2 }
  0x5c   : > { %v433_v30 = vld [vmem:[#allocation2] sm:$0xff] }
  0x5d   : > { %500 = vmatpush.bf16.msra.mxu1 %v757_v5 }
  0x5e   : > { %709 = vmatmul.msk.bf16.vlgmr.msra.gmra.mxu0 %vm397_vm0, %v376_v3 }
  0x61   : > { %501 = vmatpush.bf16.msra.mxu1 %v756_v6 }
  0x65   : > { %502 = vmatpush.bf16.msra.mxu1 %v755_v7 }
  0x69   : > { %503 = vmatpush.bf16.msra.mxu1 %v754_v8 }
  0x6d   : > { %504 = vmatpush.bf16.msra.mxu1 %v753_v9 }
  0x71   : > { %505 = vmatpush.bf16.msra.mxu1 %v752_v10 }
  0x75   : > { %506 = vmatpush.bf16.msra.mxu1 %v751_v11 }
  0xdb   : > { %v410_v13 = vpop.f32.mrf.mxu0 }
  0xdc   : > { %v411_v14 = vadd.f32 %v880_v12, %v410_v13 }
  0xde   : > { %v710_v15 = vmul.f32 -1.442695, %v411_v14 }
  0xe0   : > { %881 = vpow2.f32 %v710_v15 }
  0xe3   : > { %v412_v16 = vpop.f32.mrf.mxu0 }
  0xe6   : > { %v882_v17 = vpop.eup %881 }
  0xe7   : > { %v417_v18 = vadd.f32 1.0, %v882_v17 }
  0xe9   : > { %883 = vrcp.f32 %v417_v18  ;;  %v429_v22 = vand.u32 2147483648, %v417_v18  ;;  %v427_v24 = vand.u32 2147483647, %v417_v18  ;;  %vm423_vm2 = vweird.f32 %v417_v18 }
  0xeb   : > { %v430_v26 = vor.u32 1.1754944e-38, %v429_v22  ;;  %vm428_vm4 = vcmp.eq.f32.partialorder %v427_v24, 8.507059e+37 }
  0xef   : > { %v884_v19 = vpop.eup %883 }
  0xf0   : > { %v419_v20 = vmul.f32 %v884_v19, %v417_v18  ;;  %vm424_vm1 = vweird.f32 %v884_v19 }
  0xf1   : > { %vm425_vm3 = vmor %vm423_vm2, %vm424_vm1 }
  0xf2   : > { %v420_v21 = vsub.f32 1.0, %v419_v20 }
  0xf4   : > { %v421_v23 = vmul.f32 %v884_v19, %v420_v21 }
  0xf6   : > { %v422_v25 = vadd.f32 %v884_v19, %v421_v23 }
  0xf8   : > { %v426_v27 = vsel %vm425_vm3, %v884_v19, %v422_v25 }
  0xf9   : > { %v431_v28 = vsel %vm428_vm4, %v430_v26, %v426_v27 }
  0xfa   : > { %v434_v29 = vpack.c.bf16 %v431_v28, %v431_v28 }
  0xfc   : > { %507 = vmatmul.bf16.vlgmr.msra.gmra.mxu1 %v434_v29 }
 0x179   : > { %v508_v31 = vpop.f32.mrf.mxu1 }
 0x17a   : > { %v512_v32 = vadd.f32 %v508_v31, %v433_v30 }
 0x17c   : > { %513 = vst [vmem:[#allocation2] sm:$0xff] %v512_v32 }
 0x17d   : > { %517 = sbr.rel (%p743_p7) target bundleno = 391 (0x187), region = 64 }
 0x181   : > { %v510_v33 = vpop.f32.mrf.mxu1 }
 0x182   : > { %v885_v35 = vld [vmem:[%s1501_s10] ss:$0 sm:$0xff] }
 0x183   : > { %v518_v34 = vld [vmem:[#allocation2] sm:$0xff] }
 0x184   : > { %v523_v36 = vadd.f32 %v885_v35, %v518_v34 }
 0x186   : > { %524 = vst [vmem:[%s1386_s12] sm:$0xff] %v523_v36 }
 0x187 PF: > { %s1502_s27 = sld [smem:[#allocation19_spill]]  ;;  %s538_s24 = sshll.u32 %s1386_s12, 4  ;;  %s539_s24 = int_to_ptr.vmem [resolvable:$true] %s538_s24 }
 0x188   : > { %s1503_s11 = sld [smem:[#allocation29_spill]]  ;;  %s526_s8 = scalar_lea.sflag [#allocation5], %s1359_s16 }
 0x18d   : > { %s745_s18 = sshll.u32 %s1502_s27, 3 }
 0x18e   : > { %s536_s0 = scalar_lea.hbm %s1503_s11, %s745_s18  ;;  %s1026_s4 = scalar_lea.hbm %s1503_s11, 16 }
 0x18f   : > { %s540_s17 = sshll.u32 %s536_s0, 4  ;;  %s541_s17 = int_to_ptr.hbm [resolvable:$true] %s540_s17 }
 0x190   : > { %s1020_s21 = sshra.s32 %s541_s17, 4  ;;  %s1021_s21 = int_to_ptr.hbm [resolvable:$true] %s1020_s21 }
 0x191   : > { %s1022_s6 = scalar_lea.hbm %s1021_s21, 8  ;;  %p1027_p3 = scmp.lt.s32.totalorder %s1021_s21, %s1503_s11 }
 0x192   : > { %p1023_p10 = scmp.ne.s32.totalorder %s1021_s21, %s1022_s6  ;;  %p1028_p0 = scmp.lt.s32.totalorder %s1026_s4, %s1022_s6 }
 0x194   : > { %p1024_p11 = pnand %p1023_p10, %p1317_p12  ;;  %p1029_p5 = por %p1028_p0, %p1027_p3 }
 0x196   : > { %p1025_p1 = pneg %p1024_p11 }
 0x198   : > { %p1030_p6 = pnand %p1029_p5, %p1025_p1 }
 0x19a   : > { %1033 = shalt.err (!%p1030_p6)
}
 0x19b   : > { %767 = dma.vmem_to_hbm [thread:$0]  (%p1317_p12), %s539_s24, 128, %s541_s17, %s526_s8  }
 0x19c PF: > { %s1504_s16 = sld [smem:[#allocation17_spill]]  ;;  %p787_p8 = scmp.ge.s32.totalorder %s1136_s28, 2 }
 0x19e   : > { %p783_p9 = pnand %p787_p8, %p1326_p13 }
 0x1a0   : > { %p784_p2 = pneg %p783_p9 }
 0x1a2   : > { %s552_s25 = sand.u32 1, %s1504_s16  }
 0x1a3   : > { %s553_s9 = scalar_lea.sflag [#allocation5], %s552_s25 }
 0x1a4   : > { %1091 = dma.done.wait (%p784_p2), %s553_s9, 128  }
 0x1a5   : > { %1093 = vsyncadd (%p784_p2), %s553_s9, 4294967168  ;;  %s27_s28 = sadd.s32 1, %s1136_s28   ;;  %s1506_s12 = sld [smem:[#allocation16_spill]] }
 0x1a6   : > { %p24_p4 = scmp.ge.s32.totalorder %s27_s28, 6   ;;  %s1507_s20 = sld [smem:[#allocation23_spill]] }
 0x1a7   : > { %s1508_s5 = sld [smem:[#allocation18_spill]]  ;;  %s1513_s18 = smov %s1100_s19 }
 0x1a8   : > { %s1509_s23 = sld [smem:[#allocation24_spill]]  ;;  %s1515_s21 = smov %s1112_s22 }
 0x1a9   : > { %s1510_s25 = sld [smem:[#allocation20_spill]]  ;;  %s1517_s24 = smov %s1128_s26 }
 0x1aa   : > { %s1511_s29 = sld [smem:[#allocation21_spill]] }
 0x1ab   : > { %s1512_s27 = sld [smem:[#allocation22_spill]]  ;;  %s1514_s19 = smov %s1506_s12 }
 0x1ac   :  { %26 = sbr.rel (!%p24_p4) target bundleno = 18 (0x12), region = 130 }
 0x1ad   : > { %s1516_s22 = smov %s1508_s5 }
 0x1b0   : > { %s1518_s26 = smov %s1511_s29 }
 0x1b1   :  { %559 = vsyncpa [#allocation4], 1 }
 0x1b2   :  { %561 = vsyncpa [#allocation4 + $0x1], 1 }
 0x1b3   :  { %562 = vsyncpa [#allocation7], 1 }
 0x1b4   :  { %564 = vsyncpa [#allocation7 + $0x1], 1 }
 0x1b5   :  { %565 = vsyncpa [#allocation10], 1 }
 0x1b6   :  { %567 = vsyncpa [#allocation10 + $0x1], 1 }
 0x1b7   :  { %568 = vsyncpa [#allocation5], 1 }
 0x1b8   :  { %570 = vsyncpa [#allocation5 + $0x1], 1 }

</bundles_post_ra>
